<compile_context>
chip_gen: v5e
topology: v5e:2x2
jax: 0.10.0
libtpu: 0.0.40
codegen_flags: <defaults>
</compile_context>

<pallas_src>
import jax
import jax.numpy as jnp
from jax.experimental import pallas as pl
from jax.experimental.pallas import tpu as pltpu


# --------------------------------------------------------------------------- #
# helpers
# --------------------------------------------------------------------------- #
def _round_up(v, m):
    return ((v + m - 1) // m) * m


def _cdiv(a, b):
    return -(-a // b)


def _sublane_align(dt):
    # preferred sublane multiple: f32 -> 8, bf16 -> 16, int8 -> 32
    return max(8, 32 // max(1, jnp.dtype(dt).itemsize))


# --------------------------------------------------------------------------- #
# kernel
# --------------------------------------------------------------------------- #
def _make_fusion_kernel(tile_f, fx, fe_list, use_weight):
    """Fusion over (nb, tile_f) lane-dense blocks.

    tile_f:  lane-tile width (multiple of 128).
    fx:      logical flat output width (Cx * H * W).
    fe_list: per fused input, number of leading flat lanes that contribute
             (min(Ca, Cx) * H * W).  fe < fx  <=>  narrow input (prefix add).
    """
    n_fused = len(fe_list)

    def kernel(*refs):
        if use_weight:
            w_ref, refs = refs[0], refs[1:]
        x_ref = refs[0]
        a_refs = refs[1:1 + n_fused]
        o_ref = refs[1 + n_fused]

        # Global lane offset of this tile (scalar unit).
        lane0 = pl.program_id(1) * tile_f

        if use_weight:
            # Hoist SMEM scalar reads out of the accumulation chain.
            w = [w_ref[i] for i in range(n_fused + 1)]

        # f32 accumulation, upcast fused per term, single cast on store.
        y = x_ref[...].astype(jnp.float32)
        if use_weight:
            y = y * w[0]

        for i, (a_ref, fe) in enumerate(zip(a_refs, fe_list)):
            a = a_ref[...].astype(jnp.float32)
            if use_weight:
                a = a * w[i + 1]
            if fe < fx:
                # Narrow input: only global lanes < fe (== first Ca channels of
                # the channel-major flatten) contribute.  Fused iota/compare/
                # select — no materialized zero-padding temporaries; lane tiles
                # entirely past fe add 0 from a block whose DMA was already
                # elided (its clamped block index did not change).
                lane = lane0 + jax.lax.broadcasted_iota(jnp.int32, a.shape, 1)
                a = jnp.where(lane < fe, a, 0.0)
            y = y + a

        o_ref[...] = y.astype(o_ref.dtype)

    return kernel


# --------------------------------------------------------------------------- #
# wrapper
# --------------------------------------------------------------------------- #
def weighted_feature_fusion(x, fused, w_param=None):
    """x: (N, Cx, H, W); fused: list of (N, Ci, H, W); w_param: (n,) or None."""
    N, Cx, H, W = x.shape
    hw = H * W
    fx = Cx * hw
    n = len(fused) + 1
    use_weight = w_param is not None
    out_dtype = x.dtype

    # ---- layout: channel-major flatten of (C, H, W) into one lane-dense axis.
    # "first Ca channels" == "first Ca*hw flat lanes", so prefix-add semantics
    # survive the reshape while the minor dim becomes a large 128-multiple.
    x2 = x.reshape(N, fx)
    fa_list, fused2 = [], []
    for a in fused:
        Na, Ca, Ha, Wa = a.shape
        assert Na == N and Ha == H and Wa == W
        fa = Ca * hw
        fa_list.append(fa)
        fused2.append(a.reshape(N, fa))
    fe_list = tuple(min(fa, fx) for fa in fa_list)   # prefix boundary per input

    F_OUT = _round_up(fx, 128)        # lane-dense, unmasked-vst output width
    q = F_OUT // 128

    # ---- generation-aware VMEM budget ---------------------------------------
    try:
        vmem_cap = int(pltpu.get_tpu_info().vmem_capacity_bytes)
    except Exception:                  # pragma: no cover - conservative fallback
        vmem_cap = 64 << 20            # v7x per-core size (safest assumption)
    budget = (22 << 20) if vmem_cap <= (64 << 20) else (64 << 20)

    dtypes = [x.dtype, out_dtype] + [a.dtype for a in fused]
    row_align = max(_sublane_align(d) for d in dtypes)
    sum_io_bytes = sum(jnp.dtype(d).itemsize for d in dtypes)
    # double-buffered DMA windows + ~4 f32-equivalents of compute intermediates
    per_elem_bytes = 2 * sum_io_bytes + 16
    elem_budget = max(budget // per_elem_bytes, row_align * 128)

    # ---- lane tile: 128-multiple, budget-bounded, prefer one that divides
    # F_OUT exactly so every output store is a full unmasked block ------------
    cap_lanes = max(128, min(F_OUT, (elem_budget // row_align) // 128 * 128))
    narrow_lim = min([_round_up(f, 128) for f in fa_list] + [F_OUT])
    if narrow_lim >= min(512, F_OUT):
        # Keep tiles within the narrowest fused input when that still allows a
        # reasonable (>=512-lane) tile — every DMA stays a plain ragged-tail.
        cap_lanes = min(cap_lanes, narrow_lim)
    cap_chunks = cap_lanes // 128
    best = 1
    for d in range(1, int(q ** 0.5) + 1):
        if q % d == 0:
            for cand in (d, q // d):
                if cand <= cap_chunks and cand > best:
                    best = cand
    tile_chunks = best if best * 2 >= cap_chunks else cap_chunks
    TILE_F = tile_chunks * 128

    # ---- row block: as tall as the budget allows, sublane-packing aligned.
    # By construction TILE_F <= elem_budget // row_align, so nb never has to be
    # forced up past the budget.
    nb = max(1, elem_budget // TILE_F)
    if nb >= N:
        nb = N                          # block dim == full dim: always legal
    else:
        nb = max(row_align, (nb // row_align) * row_align)

    # ---- guarantee >= 2 grid steps on megacore parts when it is worth it ----
    n_lane_blocks = _cdiv(F_OUT, TILE_F)
    n_row_blocks = _cdiv(N, nb)
    out_bytes_total = N * F_OUT * jnp.dtype(out_dtype).itemsize
    if (n_row_blocks * n_lane_blocks) < 2 and out_bytes_total >= (1 << 20) \
            and F_OUT >= 256:
        TILE_F = _round_up(_cdiv(F_OUT, 2), 128)
        n_lane_blocks = _cdiv(F_OUT, TILE_F)
    grid = (n_row_blocks, n_lane_blocks)

    # ---- tiny safety pad: inputs narrower than one lane tile are zero-padded
    # in HBM up to TILE_F (at most TILE_F lanes per row) so every DMA block
    # start+extent is an ordinary in-bounds / ragged-tail case -----------------
    def _pad_lanes(a2):
        if a2.shape[1] < TILE_F:
            a2 = jnp.pad(a2, ((0, 0), (0, TILE_F - a2.shape[1])))
        return a2
    x2 = _pad_lanes(x2)
    fused2 = [_pad_lanes(a2) for a2 in fused2]

    # ---- VMEM sizing: pipeline buffers + f32 intermediates, never below need.
    needed = nb * TILE_F * per_elem_bytes
    vmem_limit = max(needed + (6 << 20), 32 << 20)
    vmem_limit = min(vmem_limit, max(vmem_cap - (4 << 20), needed + (2 << 20)))
    vmem_limit = int(vmem_limit)

    # ---- specs --------------------------------------------------------------
    in_specs, inputs = [], []
    if use_weight:
        # n scalars: sigmoid(w) * 2/n, matches torch.sigmoid(self.w) * (2/n).
        w_eff = jax.nn.sigmoid(w_param.astype(jnp.float32)) * (2.0 / n)
        in_specs.append(pl.BlockSpec(memory_space=pltpu.SMEM))
        inputs.append(w_eff)

    in_specs.append(pl.BlockSpec((nb, TILE_F), lambda b, j: (b, j)))
    inputs.append(x2)
    for a2 in fused2:
        # Clamp the lane-block index to this input's own extent: lane tiles
        # past a narrow input's width keep returning the same block index, so
        # Pallas skips the re-fetch and the kernel masks the stale data to 0.
        last_blk = _cdiv(a2.shape[1], TILE_F) - 1
        in_specs.append(pl.BlockSpec(
            (nb, TILE_F), lambda b, j, last=last_blk: (b, jnp.minimum(j, last))))
        inputs.append(a2)
    # NOTE: a ragged final row block (N % nb != 0) relies on Pallas masking the
    # out-of-bounds rows — benign for this purely elementwise op.
    out_spec = pl.BlockSpec((nb, TILE_F), lambda b, j: (b, j))

    read_bytes = N * fx * x.dtype.itemsize + sum(
        N * min(fa, n_lane_blocks * TILE_F) * a2.dtype.itemsize
        for fa, a2 in zip(fa_list, fused2))
    write_bytes = N * F_OUT * jnp.dtype(out_dtype).itemsize
    flops = ((2 * n - 1) if use_weight else (n - 1)) * N * fx
    cost = pl.CostEstimate(flops=int(flops), transcendentals=0,
                           bytes_accessed=int(read_bytes + write_bytes))

    kernel = _make_fusion_kernel(TILE_F, fx, fe_list, use_weight)
    out = pl.pallas_call(
        kernel,
        out_shape=jax.ShapeDtypeStruct((N, F_OUT), out_dtype),
        grid=grid,
        in_specs=in_specs,
        out_specs=out_spec,
        compiler_params=pltpu.CompilerParams(
            dimension_semantics=("parallel", "parallel"),
            vmem_limit_bytes=vmem_limit),
        cost_estimate=cost,
    )(*inputs)

    if F_OUT != fx:
        out = out[:, :fx]
    return out.reshape(N, Cx, H, W)


# --------------------------------------------------------------------------- #
# pure-JAX reference for verification
# --------------------------------------------------------------------------- #
def _reference(x, fused, w_param=None):
    n = len(fused) + 1
    if w_param is not None:
        w = jax.nn.sigmoid(w_param) * (2.0 / n)
        y = x * w[0]
    else:
        y = x
    nx = x.shape[1]
    for i, a in enumerate(fused):
        if w_param is not None:
            a = a * w[i + 1]
        na = a.shape[1]
        if nx == na:
            y = y + a
        elif nx > na:
            y = y.at[:, :na].add(a)
        else:
            y = y + a[:, :nx]
    return y


if __name__ == "__main__":
    key = jax.random.PRNGKey(0)
    ks = jax.random.split(key, 10)

    # --- Test 1: weighted fusion, all three channel-count cases --------------
    N, H, W = 2, 16, 16
    x = jax.random.normal(ks[0], (N, 6, H, W), jnp.float32)
    fused = [
        jax.random.normal(ks[1], (N, 6, H, W), jnp.float32),  # Cx == Ca
        jax.random.normal(ks[2], (N, 4, H, W), jnp.float32),  # Cx >  Ca (prefix add)
        jax.random.normal(ks[3], (N, 8, H, W), jnp.float32),  # Cx <  Ca (prefix read)
    ]
    w_param = jax.random.normal(ks[4], (len(fused) + 1,), jnp.float32) * 0.5
    out = jax.block_until_ready(weighted_feature_fusion(x, fused, w_param))
    ref = _reference(x, fused, w_param)
    assert out.shape == ref.shape and out.dtype == ref.dtype
    assert jnp.allclose(out, ref, atol=1e-5, rtol=1e-5), "weighted mismatch"

    # --- Test 2: weight=False variant (plain sum), equal channels ------------
    x_b = jax.random.normal(ks[5], (4, 8, H, W), jnp.float32)
    fused_b = [jax.random.normal(ks[6], (4, 8, H, W), jnp.float32)]
    out_b = jax.block_until_ready(weighted_feature_fusion(x_b, fused_b, None))
    assert jnp.allclose(out_b, x_b + fused_b[0], atol=1e-5, rtol=1e-5), \
        "unweighted mismatch"

    # --- Test 3: weighted, non-128-aligned flat width (hw=100), narrow+wide --
    x_c = jax.random.normal(ks[7], (2, 5, 10, 10), jnp.float32)
    fused_c = [
        jax.random.normal(ks[8], (2, 3, 10, 10), jnp.float32),  # narrower
        jax.random.normal(ks[9], (2, 7, 10, 10), jnp.float32),  # wider
    ]
    w_c = jax.random.normal(ks[4], (3,), jnp.float32) * 0.3
    out_c = jax.block_until_ready(weighted_feature_fusion(x_c, fused_c, w_c))
    ref_c = _reference(x_c, fused_c, w_c)
    assert jnp.allclose(out_c, ref_c, atol=1e-5, rtol=1e-5), "non-aligned mismatch"

    print("KERNEL_OK")
</pallas_src>

<mosaic_0001>
module attributes {stable_mosaic.version = 11 : i64} {
  func.func @kernel(%arg0: i32, %arg1: i32, %arg2: memref<4xf32, #tpu.memory_space<smem>>, %arg3: memref<2x768xf32, #tpu.memory_space<vmem>>, %arg4: memref<2x768xf32, #tpu.memory_space<vmem>>, %arg5: memref<2x768xf32, #tpu.memory_space<vmem>>, %arg6: memref<2x768xf32, #tpu.memory_space<vmem>>, %arg7: memref<2x768xf32, #tpu.memory_space<vmem>>) attributes {dimension_semantics = [#tpu.dimension_semantics<parallel>, #tpu.dimension_semantics<parallel>], iteration_bounds = array<i64: 1, 2>, scalar_prefetch = 0 : i64, scratch_operands = 0 : i64, tpu.core_type = #tpu.core_type<tc>, window_params = [{transform_indices = @transform_0, window_bounds = array<i64: 4>}, {transform_indices = @transform_1, window_bounds = array<i64: 2, 768>}, {transform_indices = @transform_2, window_bounds = array<i64: 2, 768>}, {transform_indices = @transform_3, window_bounds = array<i64: 2, 768>}, {transform_indices = @transform_4, window_bounds = array<i64: 2, 768>}, {transform_indices = @transform_5, window_bounds = array<i64: 2, 768>}]} {
    %c768_i32 = arith.constant 768 : i32
    %0 = arith.muli %arg1, %c768_i32 : i32
    %c0 = arith.constant 0 : index
    %1 = memref.load %arg2[%c0] : memref<4xf32, #tpu.memory_space<smem>>
    %c1 = arith.constant 1 : index
    %2 = memref.load %arg2[%c1] : memref<4xf32, #tpu.memory_space<smem>>
    %c2 = arith.constant 2 : index
    %3 = memref.load %arg2[%c2] : memref<4xf32, #tpu.memory_space<smem>>
    %c3 = arith.constant 3 : index
    %4 = memref.load %arg2[%c3] : memref<4xf32, #tpu.memory_space<smem>>
    %c0_0 = arith.constant 0 : index
    %c0_1 = arith.constant 0 : index
    %5 = vector.load %arg3[%c0_0, %c0_1] : memref<2x768xf32, #tpu.memory_space<vmem>>, vector<2x768xf32>
    %6 = vector.broadcast %1 : f32 to vector<2x768xf32>
    %7 = arith.mulf %5, %6 : vector<2x768xf32>
    %c0_2 = arith.constant 0 : index
    %c0_3 = arith.constant 0 : index
    %8 = vector.load %arg4[%c0_2, %c0_3] : memref<2x768xf32, #tpu.memory_space<vmem>>, vector<2x768xf32>
    %9 = vector.broadcast %2 : f32 to vector<2x768xf32>
    %10 = arith.mulf %8, %9 : vector<2x768xf32>
    %11 = arith.addf %7, %10 : vector<2x768xf32>
    %c0_4 = arith.constant 0 : index
    %c0_5 = arith.constant 0 : index
    %12 = vector.load %arg5[%c0_4, %c0_5] : memref<2x768xf32, #tpu.memory_space<vmem>>, vector<2x768xf32>
    %13 = vector.broadcast %3 : f32 to vector<2x768xf32>
    %14 = arith.mulf %12, %13 : vector<2x768xf32>
    %15 = tpu.iota {dimensions = array<i32: 1>} : vector<2x768xi32>
    %16 = vector.broadcast %0 : i32 to vector<2x768xi32>
    %17 = arith.addi %16, %15 : vector<2x768xi32>
    %c1024_i32 = arith.constant 1024 : i32
    %18 = vector.broadcast %c1024_i32 : i32 to vector<2x768xi32>
    %19 = arith.cmpi slt, %17, %18 : vector<2x768xi32>
    %cst = arith.constant 0.000000e+00 : f32
    %20 = vector.broadcast %cst : f32 to vector<2x768xf32>
    %21 = arith.select %19, %14, %20 : vector<2x768xi1>, vector<2x768xf32>
    %22 = arith.addf %11, %21 : vector<2x768xf32>
    %c0_6 = arith.constant 0 : index
    %c0_7 = arith.constant 0 : index
    %23 = vector.load %arg6[%c0_6, %c0_7] : memref<2x768xf32, #tpu.memory_space<vmem>>, vector<2x768xf32>
    %24 = vector.broadcast %4 : f32 to vector<2x768xf32>
    %25 = arith.mulf %23, %24 : vector<2x768xf32>
    %26 = arith.addf %22, %25 : vector<2x768xf32>
    %c0_8 = arith.constant 0 : index
    %c0_9 = arith.constant 0 : index
    %27 = vector.load %arg7[%c0_8, %c0_9] : memref<2x768xf32, #tpu.memory_space<vmem>>, vector<2x768xf32>
    tpu.vector_store %arg7[%c0_8, %c0_9], %26 {strides = array<i32>} : memref<2x768xf32, #tpu.memory_space<vmem>>, vector<2x768xf32>,
    return
  }
  func.func @transform_0(%arg0: i32, %arg1: i32) -> i32 {
    %c0_i32 = arith.constant 0 : i32
    %c0_i32_0 = arith.constant 0 : i32
    return %c0_i32 : i32
  }
  func.func @transform_1(%arg0: i32, %arg1: i32) -> (i32, i32) {
    %c0_i32 = arith.constant 0 : i32
    return %arg0, %arg1 : i32, i32
  }
  func.func @transform_2(%arg0: i32, %arg1: i32) -> (i32, i32) {
    %c1_i32 = arith.constant 1 : i32
    %0 = arith.minsi %arg1, %c1_i32 : i32
    %c0_i32 = arith.constant 0 : i32
    return %arg0, %0 : i32, i32
  }
  func.func @transform_3(%arg0: i32, %arg1: i32) -> (i32, i32) {
    %c1_i32 = arith.constant 1 : i32
    %0 = arith.minsi %arg1, %c1_i32 : i32
    %c0_i32 = arith.constant 0 : i32
    return %arg0, %0 : i32, i32
  }
  func.func @transform_4(%arg0: i32, %arg1: i32) -> (i32, i32) {
    %c2_i32 = arith.constant 2 : i32
    %0 = arith.minsi %arg1, %c2_i32 : i32
    %c0_i32 = arith.constant 0 : i32
    return %arg0, %0 : i32, i32
  }
  func.func @transform_5(%arg0: i32, %arg1: i32) -> (i32, i32) {
    %c0_i32 = arith.constant 0 : i32
    return %arg0, %arg1 : i32, i32
  }
}

</mosaic_0001>

<bundles_post_ra>
// kernel: tpu_custom_call.1
= control target key start
LH: loop header
LB: loop body
LE: loop exit
PB: predicated region body
PF: predicated region fallthrough
CT: control target
= control target key end

     0   :  { %s1617_s0 = inlined_call_operand.hbm [shape: f32[4], index: 0, kind: input, shape index: {}]   ;;  %s1618_s1 = inlined_call_operand.hbm [shape: f32[2,1536], index: 1, kind: input, shape index: {}]   ;;  %s1619_s2 = inlined_call_operand.hbm [shape: f32[2,1536], index: 2, kind: input, shape index: {}]   ;;  %s1620_s3 = inlined_call_operand.hbm [shape: f32[2,1024], index: 3, kind: input, shape index: {}]   ;;  %s1621_s4 = inlined_call_operand.hbm [shape: f32[2,2048], index: 4, kind: input, shape index: {}]   ;;  %s1622_s5 = inlined_call_operand.hbm [shape: f32[2,1536], index: 5, kind: output, shape index: {}]  }
   0x1   :  { %1647 = sst [smem:[#allocation34_spill]] %s1617_s0 }
   0x2   :  { %1648 = sst [smem:[#allocation35_spill]] %s1622_s5 }
   0x3   :  { %10 = vsyncpa [#allocation5], 0 }
   0x4   :  { %11 = vsyncpa [#allocation3], 0 }
   0x5   :  { %13 = vsyncpa [#allocation3 + $0x1], 0 }
   0x6   :  { %14 = vsyncpa [#allocation8], 0 }
   0x7   :  { %16 = vsyncpa [#allocation8 + $0x1], 0 }
   0x8   :  { %17 = vsyncpa [#allocation11], 0 }
   0x9   :  { %19 = vsyncpa [#allocation11 + $0x1], 0 }
   0xa   :  { %20 = vsyncpa [#allocation4], 0 }
   0xb   :  { %22 = vsyncpa [#allocation4 + $0x1], 0  ;;  %s1223_s18 = smov 0   ;;  %s1225_s19 = smov 0  }
   0xc   :  { %s1227_s20 = smov 0   ;;  %s1229_s21 = smov 0  }
   0xd   :  { %s1231_s22 = smov 0   ;;  %s1233_s23 = smov 0  }
   0xe   :  { %s1235_s24 = smov 0   ;;  %s1237_s25 = smov 0  }
   0xf   :  { %s1239_s26 = smov 0   ;;  %s1241_s27 = smov 0  }
  0x10   :  { %s1243_s28 = smov 0   ;;  %s1245_s29 = smov 0  }
  0x11 LB: > { %1649 = sst [smem:[#allocation18_spill]] %s1148_s19  ;;  %s1284_s30 = sadd.s32 4294967295, %s1188_s29   ;;  %s1188_s29 = sphi %s1245_s29, %s28_s29   ;;  %s1184_s28 = sphi %s1243_s28, %s1711_s28   ;;  %s1180_s27 = sphi %s1241_s27, %s1710_s27   ;;  %s1176_s26 = sphi %s1239_s26, %s1704_s26   ;;  %s1172_s25 = sphi %s1237_s25, %s1703_s25   ;;  %s1168_s24 = sphi %s1235_s24, %s1702_s24   ;;  %s1164_s23 = sphi %s1233_s23, %s1709_s23   ;;  %s1160_s22 = sphi %s1231_s22, %s1708_s22   ;;  %s1156_s21 = sphi %s1229_s21, %s1700_s21   ;;  %s1152_s20 = sphi %s1227_s20, %s1707_s20   ;;  %s1148_s19 = sphi %s1225_s19, %s1706_s19   ;;  %s1144_s18 = sphi %s1223_s18, %s1698_s18  }
  0x12   : > { %1650 = sst [smem:[#allocation19_spill]] %s1160_s22  ;;  %s37_s7 = sadd.s32 1, %s1184_s28 }
  0x13   : > { %1651 = sst [smem:[#allocation20_spill]] %s1168_s24  ;;  %s70_s8 = sadd.s32 1, %s1176_s26 }
  0x14   : > { %1652 = sst [smem:[#allocation21_spill]] %s1172_s25  ;;  %p38_p0 = scmp.ge.s32.totalorder %s37_s7, 2 }
  0x15   : > { %1653 = sst [smem:[#allocation22_spill]] %s1176_s26  ;;  %p77_p1 = scmp.ne.s32.totalorder %s1176_s26, %s1172_s25 }
  0x16   : > { %1654 = sst [smem:[#allocation23_spill]] %s1180_s27  ;;  %p78_p2 = scmp.eq.s32.totalorder %s1188_s29, 0 }
  0x17   : > { %1655 = sst [smem:[#allocation24_spill]] %s1284_s30  ;;  %p1624_p3 = scmp.ne.s32.totalorder %s1172_s25, %s1168_s24 }
  0x18   : > { %s1713_s7 = smov (%p38_p0, %s37_s7), 0  ;;  %p1301_p4 = por %p78_p2, %p77_p1 }
  0x19   : > { %1656 = sst [smem:[#allocation25_spill]] %s1713_s7  ;;  %p1646_p5 = scmp.eq.s32.totalorder %s1284_s30, 0 }
  0x1a   : > { %s66_s10 = ssub.s32 %s1184_s28, %s1713_s7  ;;  %p93_p6 = scmp.lt.s32.totalorder %s1184_s28, 1 }
  0x1b   : > { %p1309_p7 = scmp.eq.s32.totalorder %s66_s10, 0  ;;  %p1318_p8 = por %p1646_p5, %p1624_p3 }
  0x1c   : > { %s1323_s13 = scalar_select %p93_p6, %s1184_s28, 1 }
  0x1d   : > { %s1659_s12 = scalar_select %p1318_p8, 1, 0 }
  0x1e   : > { %s1328_s14 = scalar_select %p1309_p7, %s1176_s26, %s70_s8  }
  0x1f   : > { %1660 = sst [smem:[#allocation26_spill]] %s1659_s12  ;;  %p95_p9 = scmp.lt.s32.totalorder %s1713_s7, 1 }
  0x20   : > { %1661 = sst [smem:[#allocation27_spill]] %s1328_s14  ;;  %s102_s15 = sadd.s32 1, %s1164_s23 }
  0x21   : > { %p109_p10 = scmp.ne.s32.totalorder %s1164_s23, %s1160_s22  ;;  %p115_p11 = scmp.ne.s32.totalorder %s1160_s22, %s1156_s21 }
  0x22   : > { %s96_s16 = scalar_select %p95_p9, %s1713_s7, 1 }
  0x23   : > { %p1339_p12 = por %p109_p10, %p78_p2  ;;  %p1345_p13 = por %p115_p11, %p1646_p5 }
  0x24   : > { %s98_s10 = ssub.s32 %s1323_s13, %s96_s16  ;;  %s166_s21 = sadd.s32 1, %s1152_s20 }
  0x25   : > { %s1663_s8 = scalar_select %p1345_p13, 1, 0 }
  0x26   : > { %p100_p0 = scmp.eq.s32.totalorder %s98_s10, 0  ;;  %p173_p6 = scmp.ne.s32.totalorder %s1152_s20, %s1148_s19 }
  0x27   : > { %1664 = sst [smem:[#allocation28_spill]] %s1663_s8  ;;  %p179_p9 = scmp.ne.s32.totalorder %s1148_s19, %s1144_s18 }
  0x28   : > { %s1351_s6 = scalar_select %p100_p0, %s1164_s23, %s102_s15  }
  0x29   : > { %p1360_p10 = por %p173_p6, %p78_p2  ;;  %p1366_p3 = por %p179_p9, %p1646_p5 }
  0x2a   : > { %1665 = sst [smem:[#allocation29_spill]] %s1351_s6  ;;  %p205_p11 = scmp.eq.s32.totalorder %s1284_s30, 1 }
  0x2b   : > { %s1666_s7 = scalar_select %p1360_p10, 1, 0 }
  0x2c   : > { %s1667_s14 = scalar_select %p1366_p3, 1, 0 }
  0x2d   : > { %s1374_s16 = scalar_select %p1309_p7, %s1152_s20, %s166_s21  }
  0x2e   : > { %1668 = sst [smem:[#allocation30_spill]] %s1667_s14  ;;  %p1379_p0 = por %p205_p11, %p77_p1 }
  0x2f   : > { %1669 = sst [smem:[#allocation31_spill]] %s1374_s16  ;;  %s1672_s18 = sadd.s32 4294967294, %s1188_s29  }
  0x30   : > { %s1670_s15 = scalar_select %p1379_p0, 1, 0 }
  0x31   : > { %p211_p13 = scmp.eq.s32.totalorder %s1672_s18, 1  ;;  %p742_p2 = scmp.ge.s32.totalorder %s1188_s29, 1 }
  0x32   : > { %1671 = sst [smem:[#allocation32_spill]] %s1670_s15  ;;  %p218_p6 = scmp.lt.s32.totalorder %s1188_s29, 3 }
  0x33   : > { %p1673_p8 = scmp.ne.s32.totalorder %s1172_s25, %s1168_s24  ;;  %s1677_s0 = sld [smem:[#allocation34_spill]] }
  0x34   : > { %p1394_p9 = pnand %p742_p2, %p218_p6  ;;  %s1190_s18 = smov [#allocation2]  }
  0x35   : > { %p1390_p10 = por %p211_p13, %p1673_p8  ;;  %p1645_p8 = scmp.ge.s32.totalorder %s1188_s29, 2 }
  0x36   : > { %p789_p1 = pneg %p1394_p9  ;;  %s241_s11 = sand.u32 (!%p1645_p8), 1, %s1176_s26  }
  0x37   : > { %s1674_s10 = scalar_select %p1390_p10, 1, 0 }
  0x38   : > { %p790_p7 = pnand %p789_p1, %p1646_p5  ;;  %237 = sbr.rel (%p1645_p8) target bundleno = 140 (0x8c), region = 20 }
  0x39   : > { %1675 = sst [smem:[#allocation33_spill]] %s1674_s10  ;;  %s230_s16 = sshll.u32 %s1677_s0, 4  ;;  %s231_s16 = int_to_ptr.hbm [resolvable:$true] %s230_s16 }
  0x3a   : > { %792 = dma.hbm_to_smem (!%p790_p7), %s231_s16, 16, %s1190_s18, [#allocation5]  }
  0x3b   : > { %s765_s21 = smul.u32 (!%p1645_p8), 12, %s1184_s28  ;;  %s263_s27 = sand.u32 (!%p1645_p8), 1, %s1188_s29  }
  0x3c   : > { %s770_s0 = smul.u32 (!%p1645_p8), 12, %s241_s11  ;;  %s242_s14 = scalar_lea.sflag (!%p1645_p8), [#allocation3], %s241_s11 }
  0x3d   : > { %s252_s16 = scalar_lea.hbm %s1618_s1, %s765_s21  ;;  %s265_s19 = sand.u32 1, %s1164_s23  }
  0x3e   : > { %s254_s18 = sshll.u32 %s252_s16, 4  ;;  %s245_s15 = scalar_lea.vmem [#allocation6], %s770_s0  ;;  %s255_s18 = int_to_ptr.hbm [resolvable:$true] %s254_s18 }
  0x3f   : > { %s256_s5 = sshll.u32 %s245_s15, 4  ;;  %s766_s8 = smul.u32 12, %s1323_s13  ;;  %s257_s5 = int_to_ptr.vmem [resolvable:$true] %s256_s5 }
  0x40   : > { %779 = dma.hbm_to_vmem [thread:$0]  (%p1301_p4), %s255_s18, 192, %s257_s5, %s242_s14  }
  0x41   : > { %s771_s26 = smul.u32 12, %s265_s19  ;;  %s276_s25 = scalar_lea.hbm %s1619_s2, %s766_s8 }
  0x42   : > { %s278_s30 = sshll.u32 %s276_s25, 4  ;;  %s1423_s0 = scalar_lea.sflag [#allocation8], %s263_s27  ;;  %s279_s30 = int_to_ptr.hbm [resolvable:$true] %s278_s30 }
  0x43   : > { %s267_s24 = scalar_lea.vmem [#allocation7], %s771_s26  ;;  %286 = sbr.rel (!%p1339_p12) target bundleno = 103 (0x67), region = 32 }
  0x44   : > { %s280_s10 = sshll.u32 %s267_s24, 4  ;;  %s294_s5 = smul.u32 (%p1339_p12), 6, %s1323_s13  ;;  %s281_s10 = int_to_ptr.vmem [resolvable:$true] %s280_s10 }
  0x45   : > { %780 = dma.hbm_to_vmem [thread:$0]  (%p1339_p12), %s279_s30, 192, %s281_s10, %s1423_s0  }
  0x46   : > { %s295_s19 = ssub.s32 (%p1339_p12), 8, %s294_s5  ;;  %s291_s12 = scalar_lea.vmem (%p1339_p12), [#allocation9], %s771_s26 }
  0x47   : > { %p296_p4 = scmp.lt.s32.totalorder (%p1339_p12), %s295_s19, 6 }
  0x49   : > { %s1715_s19 = smov (!%p296_p4, %s295_s19), 6 }
  0x4a   : > { %s747_s22 = sshll.u32 %s1715_s19, 1 }
  0x4b   : > { %s299_s25 = ssub.s32 12, %s747_s22 }
  0x4c   : > { %s300_s9 = sshll.u32 %s299_s25, 4 }
  0x4d   : > { %301 = vsyncadd %s1423_s0, %s300_s9  ;;  %p1435_p13 = scmp.ne.s32.totalorder %s747_s22, 0  ;;  %s306_s13 = scalar_lea.hbm %s1620_s3, %s766_s8 }
  0x4e   : > { %s751_s17 = sshll.u32 %s1715_s19, 5  ;;  %s309_s15 = sshll.u32 %s306_s13, 4  ;;  %s310_s15 = int_to_ptr.hbm [resolvable:$true] %s309_s15 }
  0x4f   : > { %s311_s11 = sshll.u32 %s291_s12, 4  ;;  %s968_s16 = sshra.s32 %s310_s15, 4  ;;  %s312_s11 = int_to_ptr.vmem [resolvable:$true] %s311_s11  ;;  %s969_s16 = int_to_ptr.hbm [resolvable:$true] %s968_s16 }
  0x50   : > { %s970_s26 = sshrl.u32 %s751_s17, 4  ;;  %s979_s5 = scalar_lea.hbm %s1620_s3, 16 }
  0x51   : > { %s975_s18 = scalar_lea.hbm %s969_s16, %s970_s26 }
  0x52   : > { %p976_p12 = scmp.ne.s32.totalorder %s969_s16, %s975_s18  ;;  %p981_p6 = scmp.lt.s32.totalorder %s979_s5, %s975_s18 }
  0x54   : > { %p977_p11 = pnand %p976_p12, %p1435_p13 }
  0x56   : > { %p978_p2 = pneg %p977_p11 }
  0x58   : > { %p983_p1 = pnand %p981_p6, %p978_p2 }
  0x5a   : > { %986 = shalt.err (!%p983_p1)
}
  0x5b   : > { %s987_s8 = sshra.s32 %s312_s11, 4  ;;  %s1191_s25 = smov [#allocation9]   ;;  %s988_s8 = int_to_ptr.vmem [resolvable:$true] %s987_s8 }
  0x5c   : > { %s994_s22 = scalar_lea.vmem %s988_s8, %s970_s26  ;;  %s998_s9 = scalar_lea.vmem %s1191_s25, 24 }
  0x5d   : > { %p995_p7 = scmp.ne.s32.totalorder %s988_s8, %s994_s22  ;;  %p1000_p5 = scmp.lt.s32.totalorder %s998_s9, %s994_s22 }
  0x5f   : > { %p996_p4 = pnand %p995_p7, %p1435_p13 }
  0x61   : > { %p997_p8 = pneg %p996_p4 }
  0x63   : > { %p1002_p12 = pnand %p1000_p5, %p997_p8 }
  0x65   : > { %1005 = shalt.err (!%p1002_p12)
}
  0x66   : > { %314 = dma.hbm_to_vmem [thread:$0]  (%p1435_p13), %s310_s15, %s751_s17, %s312_s11, %s1423_s0  }
  0x67 PF: > { %p1679_p11 = scmp.ne.s32.totalorder %s1666_s7, 0 }
  0x68   : > { %s318_s12 = sand.u32 (%p1679_p11), 1, %s1152_s20   ;;  %s325_s30 = smul.u32 (%p1679_p11), 6, %s1184_s28 }
  0x69   : > { %317 = sbr.rel (!%p1679_p11) target bundleno = 140 (0x8c), region = 36  ;;  %s1464_s18 = scalar_lea.sflag (%p1679_p11), [#allocation11], %s318_s12 }
  0x6a   : > { %s773_s14 = smul.u32 (%p1679_p11), 12, %s318_s12  ;;  %s326_s13 = ssub.s32 (%p1679_p11), 16, %s325_s30 }
  0x6b   : > { %p327_p2 = scmp.lt.s32.totalorder (%p1679_p11), %s326_s13, 6 }
  0x6c   : > { %s322_s0 = scalar_lea.vmem (%p1679_p11), [#allocation10], %s773_s14 }
  0x6e   : > { %s1717_s13 = smov (!%p327_p2, %s326_s13), 6 }
  0x6f   : > { %s752_s16 = sshll.u32 %s1717_s13, 1 }
  0x70   : > { %s330_s27 = ssub.s32 12, %s752_s16 }
  0x71   : > { %s331_s26 = sshll.u32 %s330_s27, 4 }
  0x72   : > { %332 = vsyncadd %s1464_s18, %s331_s26  ;;  %p1467_p5 = scmp.ne.s32.totalorder %s752_s16, 0  ;;  %s756_s19 = sshll.u32 %s1717_s13, 5 }
  0x73   : > { %s1472_s17 = sshll.u32 %s322_s0, 4  ;;  %s337_s24 = scalar_lea.hbm %s1621_s4, %s765_s21  ;;  %s343_s17 = int_to_ptr.vmem [resolvable:$true] %s1472_s17 }
  0x74   : > { %s340_s10 = sshll.u32 %s337_s24, 4  ;;  %s1009_s8 = sshrl.u32 %s756_s19, 4  ;;  %s341_s10 = int_to_ptr.hbm [resolvable:$true] %s340_s10 }
  0x75   : > { %s1007_s5 = sshra.s32 %s341_s10, 4  ;;  %s1018_s12 = scalar_lea.hbm %s1621_s4, 32  ;;  %s1008_s5 = int_to_ptr.hbm [resolvable:$true] %s1007_s5 }
  0x76   : > { %s1014_s22 = scalar_lea.hbm %s1008_s5, %s1009_s8 }
  0x77   : > { %p1015_p8 = scmp.ne.s32.totalorder %s1008_s5, %s1014_s22  ;;  %p1020_p1 = scmp.lt.s32.totalorder %s1018_s12, %s1014_s22 }
  0x79   : > { %p1016_p13 = pnand %p1015_p8, %p1467_p5 }
  0x7b   : > { %p1017_p6 = pneg %p1016_p13 }
  0x7d   : > { %p1022_p7 = pnand %p1020_p1, %p1017_p6 }
  0x7f   : > { %1025 = shalt.err (!%p1022_p7)
}
  0x80   : > { %s1026_s21 = sshra.s32 %s343_s17, 4  ;;  %s1192_s14 = smov [#allocation10]   ;;  %s1027_s21 = int_to_ptr.vmem [resolvable:$true] %s1026_s21 }
  0x81   : > { %s1033_s30 = scalar_lea.vmem %s1027_s21, %s1009_s8  ;;  %s1037_s16 = scalar_lea.vmem %s1192_s14, 24 }
  0x82   : > { %p1034_p4 = scmp.ne.s32.totalorder %s1027_s21, %s1033_s30  ;;  %p1039_p2 = scmp.lt.s32.totalorder %s1037_s16, %s1033_s30 }
  0x84   : > { %p1035_p12 = pnand %p1034_p4, %p1467_p5 }
  0x86   : > { %p1036_p11 = pneg %p1035_p12 }
  0x88   : > { %p1041_p8 = pnand %p1039_p2, %p1036_p11 }
  0x8a   : > { %1044 = shalt.err (!%p1041_p8)
}
  0x8b   : > { %345 = dma.hbm_to_vmem [thread:$0]  (%p1467_p5), %s341_s10, %s756_s19, %s343_s17, %s1464_s18  }
  0x8c PF: > { %351 = sbr.rel (%p1394_p9) target bundleno = 216 (0xd8), region = 40  ;;  %s1681_s27 = sld [smem:[#allocation24_spill]] (!%p1394_p9) }
  0x92   : > { %p1682_p13 = scmp.eq.s32.totalorder %s1681_s27, 0 }
  0x94   : > { %1123 = dma.done.wait (%p1682_p13), [#allocation5], 16   ;;  %p1683_p6 = pmov %p1682_p13 }
  0x95   : > { %s1684_s26 = sld [smem:[#allocation21_spill]] }
  0x96   : > { %1125 = vsyncadd (%p1683_p6), [#allocation5], 4294967280  ;;  %s1685_s0 = sld [smem:[#allocation26_spill]] }
  0x9b   : > { %s1501_s15 = sand.u32 1, %s1684_s26  }
  0x9c   : > { %s774_s13 = smul.u32 12, %s1501_s15  ;;  %s359_s18 = scalar_lea.sflag [#allocation3], %s1501_s15 }
  0x9d   : > { %p1686_p5 = scmp.ne.s32.totalorder %s1685_s0, 0 }
  0x9e   : > { %s1507_s7 = scalar_lea.vmem [#allocation6], %s774_s13 }
  0x9f   : > { %1127 = dma.done.wait (%p1686_p5), %s359_s18, 192  }
  0xa0   : > { %1129 = vsyncadd (%p1686_p5), %s359_s18, 4294967104  ;;  %s1687_s6 = sld [smem:[#allocation19_spill]]  ;;  %s368_s17 = sand.u32 1, %s1681_s27  }
  0xa1   : > { %s1688_s19 = sld [smem:[#allocation28_spill]]  ;;  %s369_s10 = scalar_lea.sflag [#allocation8], %s368_s17 }
  0xa6   : > { %s370_s11 = sand.u32 1, %s1687_s6  }
  0xa7   : > { %s1515_s24 = smul.u32 12, %s370_s11  ;;  %p1689_p9 = scmp.ne.s32.totalorder %s1688_s19, 0 }
  0xa9   : > { %s372_s5 = scalar_lea.vmem [#allocation7], %s1515_s24 }
  0xaa   : > { %1131 = dma.done.wait (%p1689_p9), %s369_s10, 384  }
  0xab   : > { %1133 = vsyncadd (%p1689_p9), %s369_s10, 4294966912  ;;  %s1690_s8 = sld [smem:[#allocation18_spill]]  ;;  %s382_s12 = scalar_lea.vmem [#allocation9], %s1515_s24 }
  0xb1   : > { %s388_s25 = sand.u32 1, %s1690_s8  }
  0xb2   : > { %s1523_s9 = smul.u32 12, %s388_s25  ;;  %s389_s21 = scalar_lea.sflag [#allocation11], %s388_s25 }
  0xb4   : > { %s392_s30 = scalar_lea.vmem [#allocation10], %s1523_s9 }
  0xb5   : > { %1135 = dma.done.wait (%p1366_p3), %s389_s21, 192  }
  0xb6   : > { %1137 = vsyncadd (%p1366_p3), %s389_s21, 4294967104 }
  0xb7   : > { %398 = sfence }
  0xb8   : > { %s760_s14 = sld [smem:[#allocation2 + $0x2]]  ;;  %v477_v0 = vlaneseq  ;;  %v472_v2 = vld [vmem:[%s382_s12] sm:$0xff]  ;;  %v473_v3 = vld [vmem:[%s382_s12 + $0x8] sm:$0xf]  ;;  %v461_v16 = vld [vmem:[%s1507_s7 + $0x8] sm:$0xf] }
  0xb9   : > { %s1692_s16 = sld [smem:[#allocation23_spill]]  ;;  %v466_v18 = vld [vmem:[%s372_s5 + $0x8] sm:$0xf]  ;;  %vm530_vm0 = vcmask 1041408   ;;  %vm532_vm1 = vcmask 1045508   ;;  %v465_v26 = vld [vmem:[%s372_s5] sm:$0xff] }
  0xba   : > { %s1532_s26 = sld [smem:[#allocation2]]  ;;  %v478_v1 = vand.u32 127, %v477_v0  ;;  %v460_v25 = vld [vmem:[%s1507_s7] sm:$0xff]  ;;  %vm534_vm3 = vcmask 1043456   ;;  %v542_v27 = vld [vmem:[%s392_s30 + $0x8] sm:$0xf] }
  0xbb   : > { %s1534_s0 = sld [smem:[#allocation2 + $0x1]]  ;;  %v541_v47 = vld [vmem:[%s392_s30] sm:$0xff]  ;;  %s435_s24 = scalar_lea.vmem [#allocation12], %s774_s13 }
  0xbc   : > { %v482_v6 = vadd.s32 512, %v478_v1  ;;  %v483_v7 = vadd.s32 640, %v478_v1  ;;  %v479_v8 = vadd.s32 128, %v478_v1  ;;  %v480_v11 = vadd.s32 256, %v478_v1  ;;  %s1536_s18 = sld [smem:[#allocation2 + $0x3]]  ;;  %s566_s10 = sshll.u32 %s435_s24, 4  ;;  %s567_s10 = int_to_ptr.vmem [resolvable:$true] %s566_s10 }
  0xbd   : > { %v481_v12 = vadd.s32 384, %v478_v1  ;;  %s1693_s17 = sld [smem:[#allocation35_spill]]  ;;  %s551_s22 = scalar_lea.sflag [#allocation4], %s1501_s15 }
  0xbe   : > { %v474_v5 = vstv %s760_s14 }
  0xbf   : > { %s455_s27 = smul.u32 768, %s1692_s16  ;;  %v475_v9 = vmul.f32 %v474_v5, %v472_v2  ;;  %v476_v10 = vmul.f32 %v474_v5, %v473_v3 }
  0xc0   : > { %v462_v17 = vstv %s1532_s26  ;;  %s769_s6 = smul.u32 12, %s1692_s16 }
  0xc1   : > { %v484_v4 = vstv %s455_s27  ;;  %499 = vst [vmem:[#allocation1] ss:$4 sm:$0xff] %v475_v9  ;;  %v467_v19 = vstv %s1534_s0  ;;  %v464_v23 = vmul.f32 %v462_v17, %v461_v16  ;;  %v463_v33 = vmul.f32 %v462_v17, %v460_v25 }
  0xc2   : > { %501 = vst [vmem:[#allocation1 + $0x20] ss:$4 sm:$0xff] %v476_v10  ;;  %v489_v13 = vadd.s32 %v484_v4, %v482_v6  ;;  %v490_v14 = vadd.s32 %v484_v4, %v483_v7  ;;  %v486_v15 = vadd.s32 %v484_v4, %v479_v8  ;;  %v487_v20 = vadd.s32 %v484_v4, %v480_v11 }
  0xc3   : > { %v488_v21 = vadd.s32 %v484_v4, %v481_v12  ;;  %v485_v22 = vadd.s32 %v484_v4, %v478_v1  ;;  %v469_v24 = vmul.f32 %v467_v19, %v466_v18  ;;  %v543_v32 = vstv %s1536_s18  ;;  %s564_s11 = scalar_lea.hbm %s1693_s17, %s769_s6  ;;  %s1066_s21 = scalar_lea.hbm %s1693_s17, 24 }
  0xc4   : > { %vm495_vm2 = vcmp.lt.s32.totalorder %v489_v13, 1024  ;;  %vm496_vm4 = vcmp.lt.s32.totalorder %v490_v14, 1024  ;;  %vm492_vm5 = vcmp.lt.s32.totalorder %v486_v15, 1024  ;;  %vm493_vm6 = vcmp.lt.s32.totalorder %v487_v20, 1024  ;;  %s568_s8 = sshll.u32 %s564_s11, 4  ;;  %s569_s8 = int_to_ptr.hbm [resolvable:$true] %s568_s8 }
  0xc5   : > { %vm494_vm7 = vcmp.lt.s32.totalorder %v488_v21, 1024  ;;  %v468_v34 = vmul.f32 %v467_v19, %v465_v26  ;;  %v471_v35 = vadd.f32 %v469_v24, %v464_v23  ;;  %vm491_vm8 = vcmp.lt.s32.totalorder %v485_v22, 1024  ;;  %s1060_s25 = sshra.s32 %s569_s8, 4  ;;  %s1061_s25 = int_to_ptr.hbm [resolvable:$true] %s1060_s25 }
  0xc6   : > { %v545_v43 = vmul.f32 %v543_v32, %v542_v27  ;;  %v544_v55 = vmul.f32 %v543_v32, %v541_v47  ;;  %s1062_s9 = scalar_lea.hbm %s1061_s25, 12  ;;  %p1067_p4 = scmp.lt.s32.totalorder %s1061_s25, %s1693_s17 }
  0xc7   : > { %v470_v49 = vadd.f32 %v468_v34, %v463_v33  ;;  %p1063_p3 = scmp.ne.s32.totalorder %s1061_s25, %s1062_s9  ;;  %p1068_p12 = scmp.lt.s32.totalorder %s1066_s21, %s1062_s9 }
  0xc8   : > { %v502_v28 = vld.sshfl [vmem:[#allocation1] sm:$0xff pattern:$0x73625140]  ;;  %v503_v29 = vld.sshfl [vmem:[#allocation1 + $0x8] sm:$0xff pattern:$0x73625140] }
  0xc9   : > { %v506_v30 = vld.sshfl [vmem:[#allocation1 + $0x20] sm:$0xff pattern:$0x73625140]  ;;  %v507_v31 = vld.sshfl [vmem:[#allocation1 + $0x28] sm:$0xff pattern:$0x73625140]  ;;  %p1064_p1 = pnand %p1063_p3, %p1379_p0  ;;  %p1069_p11 = por %p1068_p12, %p1067_p4 }
  0xca   : > { %v518_v36 = vsel %vm495_vm2, %v506_v30, 0.0  ;;  %v519_v37 = vsel %vm496_vm4, %v507_v31, 0.0  ;;  %v504_v38 = vld.sshfl [vmem:[#allocation1 + $0x10] sm:$0xff pattern:$0x73625140]  ;;  %v515_v41 = vsel %vm492_vm5, %v503_v29, 0.0 }
  0xcb   : > { %v529_v39 = vrot.slane %v519_v37, 6  ;;  %v505_v40 = vld.sshfl [vmem:[#allocation1 + $0x18] sm:$0xff pattern:$0x73625140]  ;;  %v516_v42 = vsel %vm493_vm6, %v504_v38, 0.0  ;;  %v526_v45 = vrot.slane %v515_v41, 6  ;;  %p1065_p7 = pneg %p1064_p1 }
  0xcc   : > { %v517_v44 = vsel %vm494_vm7, %v505_v40, 0.0  ;;  %v527_v46 = vrot.slane %v516_v42, 4  ;;  %v514_v50 = vsel %vm491_vm8, %v502_v28, 0.0 }
  0xcd   : > { %v536_v48 = vsel %vm530_vm0, %v518_v36, %v529_v39  ;;  %v528_v51 = vrot.slane %v517_v44, 2  ;;  %v531_v53 = vsel %vm530_vm0, %v514_v50, %v526_v45  ;;  %p1070_p2 = pnand %p1069_p11, %p1065_p7 }
  0xce   : > { %v540_v52 = vadd.f32 %v536_v48, %v471_v35 }
  0xcf   : > { %v533_v54 = vsel %vm532_vm1, %v527_v46, %v528_v51 }
  0xd0   : > { %v547_v56 = vadd.f32 %v545_v43, %v540_v52  ;;  %v535_v57 = vsel %vm534_vm3, %v531_v53, %v533_v54 }
  0xd1   : > { %v539_v58 = vadd.f32 %v535_v57, %v470_v49 }
  0xd2   : > { %549 = vst [vmem:[%s435_s24 + $0x8] sm:$0xf] %v547_v56 }
  0xd3   : > { %v546_v59 = vadd.f32 %v544_v55, %v539_v58 }
  0xd5   : > { %548 = vst [vmem:[%s435_s24] sm:$0xff] %v546_v59 }
  0xd6   : > { %1073 = shalt.err (!%p1070_p2)
}
  0xd7   : > { %787 = dma.vmem_to_hbm [thread:$0]  (%p1379_p0), %s567_s10, 192, %s569_s8, %s551_s22  }
  0xd8 PF: > { %s1695_s15 = sld [smem:[#allocation20_spill]]  ;;  %p1697_p8 = scmp.ge.s32.totalorder %s1188_s29, 2 }
  0xda   : > { %p794_p13 = pnand %p1697_p8, %p1390_p10 }
  0xdc   : > { %p795_p6 = pneg %p794_p13 }
  0xde   : > { %s580_s27 = sand.u32 1, %s1695_s15  }
  0xdf   : > { %s581_s26 = scalar_lea.sflag [#allocation4], %s580_s27 }
  0xe0   : > { %1139 = dma.done.wait (%p795_p6), %s581_s26, 192  }
  0xe1   : > { %1141 = vsyncadd (%p795_p6), %s581_s26, 4294967104  ;;  %s28_s29 = sadd.s32 1, %s1188_s29   ;;  %s1698_s18 = sld [smem:[#allocation18_spill]] }
  0xe2   : > { %p25_p5 = scmp.ge.s32.totalorder %s28_s29, 4   ;;  %s1699_s0 = sld [smem:[#allocation31_spill]] }
  0xe3   : > { %s1700_s21 = sld [smem:[#allocation19_spill]]  ;;  %s1706_s19 = smov %s1152_s20 }
  0xe4   : > { %s1701_s6 = sld [smem:[#allocation29_spill]]  ;;  %s1708_s22 = smov %s1164_s23 }
  0xe5   : > { %s1702_s24 = sld [smem:[#allocation21_spill]]  ;;  %s1710_s27 = smov %s1184_s28 }
  0xe6   : > { %s1703_s25 = sld [smem:[#allocation22_spill]] }
  0xe7   : > { %s1704_s26 = sld [smem:[#allocation27_spill]] }
  0xe8   : > { %s1705_s7 = sld [smem:[#allocation25_spill]]  ;;  %s1707_s20 = smov %s1699_s0 }
  0xea   : > { %s1709_s23 = smov %s1701_s6  ;;  %27 = sbr.rel (!%p25_p5) target bundleno = 17 (0x11), region = 128 }
  0xee   : > { %s1711_s28 = smov %s1705_s7 }
  0xef   :  { %587 = vsyncpa [#allocation3], 1 }
  0xf0   :  { %589 = vsyncpa [#allocation3 + $0x1], 1 }
  0xf1   :  { %590 = vsyncpa [#allocation8], 1 }
  0xf2   :  { %592 = vsyncpa [#allocation8 + $0x1], 1 }
  0xf3   :  { %593 = vsyncpa [#allocation11], 1 }
  0xf4   :  { %595 = vsyncpa [#allocation11 + $0x1], 1 }
  0xf5   :  { %596 = vsyncpa [#allocation4], 1 }
  0xf6   :  { %598 = vsyncpa [#allocation4 + $0x1], 1 }
  0xf7   :  { %599 = vsyncpa [#allocation5], 1 }
  0xf8   :  { %601 = vsyncpa [#allocation5 + $0x1], 1 }

</bundles_post_ra>
